<compile_context>
chip_gen: v7x
topology: tpu7x:2x2x1
jax: 0.10.0
libtpu: 0.0.40
codegen_flags: <defaults>
</compile_context>

<pallas_src>
import numpy as np
import jax
import jax.numpy as jnp
from jax.experimental import pallas as pl
from jax.experimental.pallas import tpu as pltpu

# ---- hyperparameters (mirror FourierFlow.__init__ / fit-time setup) ----
N_LAGS = 8
OUTPUT_DIM = 4
HIDDEN = 32
N_FLOWS = 2
D = N_LAGS * OUTPUT_DIM                        # self.d (even -> carry_flag False)
K = D // 2                                     # self.k = ceil(d / 2)
FLIPS = [bool(i % 2) for i in range(N_FLOWS)]  # flip=True in __init__
BATCH = 2

H2 = 2 * HIDDEN                                # fused hidden width (64)
K2 = 2 * K                                     # fused output width  (32)
PW = max(H2, K2, D)                            # packed buffer lane width (64)

# ---- packed-parameter row layout (all offsets static) ----
PF = K + 2 * H2 + 3                            # rows per flow: W1|W2|W3|b1|b2|b3 = 147
B1_ROW = K + 2 * H2
B2_ROW = B1_ROW + 1
B3_ROW = B1_ROW + 2
OFF_IDFT = N_FLOWS * PF                        # 294
OFF_MASK = OFF_IDFT + 2 * K                    # 326
TOTAL_ROWS = ((OFF_MASK + 1 + 7) // 8) * 8     # pad to sublane multiple -> 328


# ------------------------------- kernel ---------------------------------------
def fourierflow_sample_kernel(z_ref, p_ref, out_ref):
    # z_ref: (2, TB, K) -- halves of the latent, already split in the wrapper
    a = z_ref[0].astype(jnp.float32)                       # columns [0:K)
    b = z_ref[1].astype(jnp.float32)                       # columns [K:D)

    # ---- inverse flow chain: reversed(bijectors), reversed(flips); statically unrolled
    for i in reversed(range(N_FLOWS)):
        f = FLIPS[i]
        z1 = b if f else a
        z2 = a if f else b

        base = i * PF
        W1 = p_ref[base:base + K, :H2]                              # (K, 2H)
        W2 = p_ref[base + K:base + K + H2, :H2]                     # (2H, 2H) block-diag
        W3 = p_ref[base + K + H2:base + K + 2 * H2, :K2]            # (2H, 2K) block-diag
        b1 = p_ref[base + B1_ROW:base + B1_ROW + 1, :H2]            # (1, 2H)
        b2 = p_ref[base + B2_ROW:base + B2_ROW + 1, :H2]            # (1, 2H)
        b3 = p_ref[base + B3_ROW:base + B3_ROW + 1, :K2]            # (1, 2K)

        # fused sigma/mu MLP: 3 matmuls + 2 sigmoids
        h = jax.nn.sigmoid(jnp.dot(z1, W1, preferred_element_type=jnp.float32) + b1)
        h = jax.nn.sigmoid(jnp.dot(h, W2, preferred_element_type=jnp.float32) + b2)
        sm = jnp.dot(h, W3, preferred_element_type=jnp.float32) + b3   # [sig | mu]
        sig = sm[:, :K]
        mu = sm[:, K:]

        x2 = (z2 - mu) * jnp.exp(-sig)
        if f:
            a, b = x2, z1
        else:
            a, b = z1, x2

    # ---- DFT.inverse as a split (K, D) + (K, D) matmul (no concat of a/b needed) ----
    idft_a = p_ref[OFF_IDFT:OFF_IDFT + K, :D]
    idft_b = p_ref[OFF_IDFT + K:OFF_IDFT + 2 * K, :D]
    x_time = (jnp.dot(a, idft_a, preferred_element_type=jnp.float32)
              + jnp.dot(b, idft_b, preferred_element_type=jnp.float32))

    # ---- interleaved activation: even feature -> identity, odd -> softplus ----
    mask = p_ref[OFF_MASK:OFF_MASK + 1, :D]                 # (1, D) precomputed is_vol mask
    sp = jnp.maximum(x_time, 0.0) + jnp.log1p(jnp.exp(-jnp.abs(x_time)))
    out_ref[...] = x_time + mask * (sp - x_time)


# ------------------------------- wrapper ---------------------------------------
def fourier_flow_forward(z, p_packed):
    """Pallas entry point. Returns (batch, n_lags, output_dim)."""
    B = z.shape[0]
    z_split = jnp.stack([z[:, :K], z[:, K:]], axis=0)       # (2, B, K)

    # batch tile: full batch if small, else a multiple-of-8 tile for pipelining
    TB = B
    if B >= 16 and B % 8 == 0:
        for cand in (2048, 1024, 512, 256, 128, 64, 32, 16, 8):
            if B % cand == 0:
                TB = cand
                break
    grid = (B // TB,)

    grid_spec = pltpu.PrefetchScalarGridSpec(
        num_scalar_prefetch=0,
        grid=grid,
        in_specs=[
            pl.BlockSpec((2, TB, K), lambda i: (0, i, 0)),          # z halves
            pl.BlockSpec(p_packed.shape, lambda i: (0, 0)),         # all params (resident)
        ],
        out_specs=pl.BlockSpec((TB, D), lambda i: (i, 0)),
    )

    out = pl.pallas_call(
        fourierflow_sample_kernel,
        out_shape=jax.ShapeDtypeStruct((B, D), jnp.float32),
        grid_spec=grid_spec,
        compiler_params=pltpu.CompilerParams(dimension_semantics=("parallel",)),
    )(z_split, p_packed)
    return out.reshape(B, N_LAGS, OUTPUT_DIM)


# ---------------- glue: parameter packing, IDFT matrix, reference ----------------
def build_idft_matrix(d):
    """Exact linear operator of DFT.inverse (reconstruct_DFT + ifftshift + ifft)."""
    k = d // 2
    W = np.zeros((d, d), dtype=np.float64)
    for j in range(d):
        v = np.zeros(d)
        v[j] = 1.0
        r, im = v[:k], v[k:]
        R = np.concatenate([r, r[::-1]])          # cat([x_real, flip(x_real)])
        I = np.concatenate([im, -im[::-1]])       # cat([x_imag, -flip(x_imag)])
        s = R + 1j * I
        W[j, :] = d * np.real(np.fft.ifft(np.fft.ifftshift(s)))
    return jnp.asarray(W, dtype=jnp.float32)


def init_params(key):
    ks = jax.random.split(key, 12)

    def w(k, shape):
        return (0.1 * jax.random.normal(k, shape)).astype(jnp.float32)

    sW1 = w(ks[0], (N_FLOWS, K, HIDDEN));      sb1 = w(ks[1], (N_FLOWS, 1, HIDDEN))
    sW2 = w(ks[2], (N_FLOWS, HIDDEN, HIDDEN)); sb2 = w(ks[3], (N_FLOWS, 1, HIDDEN))
    sW3 = w(ks[4], (N_FLOWS, HIDDEN, K));      sb3 = w(ks[5], (N_FLOWS, 1, K))
    mW1 = w(ks[6], (N_FLOWS, K, HIDDEN));      mb1 = w(ks[7], (N_FLOWS, 1, HIDDEN))
    mW2 = w(ks[8], (N_FLOWS, HIDDEN, HIDDEN)); mb2 = w(ks[9], (N_FLOWS, 1, HIDDEN))
    mW3 = w(ks[10], (N_FLOWS, HIDDEN, K));     mb3 = w(ks[11], (N_FLOWS, 1, K))
    return (sW1, sb1, sW2, sb2, sW3, sb3, mW1, mb1, mW2, mb2, mW3, mb3)


def pack_params(params, idft):
    """Fuse sigma/mu nets per flow and pack EVERYTHING into one (TOTAL_ROWS, PW) buffer."""
    (sW1, sb1, sW2, sb2, sW3, sb3, mW1, mb1, mW2, mb2, mW3, mb3) = params

    def padw(x):
        r, c = x.shape
        if c == PW:
            return x.astype(jnp.float32)
        return jnp.zeros((r, PW), jnp.float32).at[:, :c].set(x)

    rows = []
    for i in range(N_FLOWS):
        W1c = padw(jnp.concatenate([sW1[i], mW1[i]], axis=1))                 # (K, 2H)
        W2c = jnp.zeros((H2, PW), jnp.float32)
        W2c = W2c.at[:HIDDEN, :HIDDEN].set(sW2[i]).at[HIDDEN:, HIDDEN:H2].set(mW2[i])
        W3c = jnp.zeros((H2, PW), jnp.float32)
        W3c = W3c.at[:HIDDEN, :K].set(sW3[i]).at[HIDDEN:, K:K2].set(mW3[i])
        b1c = padw(jnp.concatenate([sb1[i], mb1[i]], axis=1))                 # (1, 2H)
        b2c = padw(jnp.concatenate([sb2[i], mb2[i]], axis=1))                 # (1, 2H)
        b3c = padw(jnp.concatenate([sb3[i], mb3[i]], axis=1))                 # (1, 2K)
        rows += [W1c, W2c, W3c, b1c, b2c, b3c]

    # split IDFT matrix (linear map of DFT.inverse), padded to PW lanes
    rows += [padw(idft[:K, :]), padw(idft[K:, :])]

    # is_vol mask (odd feature columns of the flattened (n_lags, output_dim) layout)
    feat = np.arange(D) % OUTPUT_DIM
    mask_np = ((feat % 2) == 1).astype(np.float32)
    rows += [padw(jnp.asarray(mask_np)[None, :])]

    p = jnp.concatenate(rows, axis=0)
    pad = TOTAL_ROWS - p.shape[0]
    if pad:
        p = jnp.concatenate([p, jnp.zeros((pad, PW), jnp.float32)], axis=0)
    assert p.shape == (TOTAL_ROWS, PW)
    return p


def reference_forward(z, params, idft):
    """Pure-JAX reference of the same math (mirrors torch semantics, unfused)."""
    (sW1, sb1, sW2, sb2, sW3, sb3, mW1, mb1, mW2, mb2, mW3, mb3) = params

    def mlp(x, w1, b1, w2, b2, w3, b3):
        h = jax.nn.sigmoid(x @ w1 + b1)
        h = jax.nn.sigmoid(h @ w2 + b2)
        return h @ w3 + b3

    for i in reversed(range(N_FLOWS)):
        f = FLIPS[i]
        z1, z2 = z[:, :K], z[:, K:]
        if f:
            z1, z2 = z2, z1
        sig = mlp(z1, sW1[i], sb1[i], sW2[i], sb2[i], sW3[i], sb3[i])
        mu = mlp(z1, mW1[i], mb1[i], mW2[i], mb2[i], mW3[i], mb3[i])
        x1 = z1
        x2 = (z2 - mu) * jnp.exp(-sig)
        if f:
            x1, x2 = x2, x1
        z = jnp.concatenate([x1, x2], axis=-1)
    x_time = z @ idft
    x = x_time.reshape(-1, N_LAGS, OUTPUT_DIM)
    sp = jnp.where(x > 0, x + jnp.log1p(jnp.exp(-x)), jnp.log1p(jnp.exp(x)))
    out = x.at[..., 1::2].set(sp[..., 1::2])
    return out


if __name__ == "__main__":
    key = jax.random.PRNGKey(0)
    kz, kp = jax.random.split(key)

    # base distribution sample z ~ N(0, I_d)   (FourierFlow.sample)
    z = jax.random.normal(kz, (BATCH, D), dtype=jnp.float32)
    params = init_params(kp)

    idft = build_idft_matrix(D)
    p_packed = pack_params(params, idft)

    out = fourier_flow_forward(z, p_packed)
    out = jax.block_until_ready(out)

    ref = reference_forward(z, params, idft)
    np.testing.assert_allclose(np.asarray(out), np.asarray(ref),
                               rtol=1e-4, atol=1e-4)
    assert out.shape == (BATCH, N_LAGS, OUTPUT_DIM)
    print("KERNEL_OK")
</pallas_src>

<mosaic_0001>
module attributes {stable_mosaic.version = 11 : i64} {
  func.func @fourierflow_sample_kernel(%arg0: i32, %arg1: memref<2x2x16xf32, #tpu.memory_space<vmem>>, %arg2: memref<328x64xf32, #tpu.memory_space<vmem>>, %arg3: memref<2x32xf32, #tpu.memory_space<vmem>>) attributes {dimension_semantics = [#tpu.dimension_semantics<parallel>], iteration_bounds = array<i64: 1>, scalar_prefetch = 0 : i64, scratch_operands = 0 : i64, tpu.core_type = #tpu.core_type<tc>, window_params = [{transform_indices = @transform_0, window_bounds = array<i64: 2, 2, 16>}, {pipeline_mode = #tpu.pipeline_mode<synchronous>, transform_indices = @transform_1, window_bounds = array<i64: 328, 64>}, {transform_indices = @transform_2, window_bounds = array<i64: 2, 32>}]} {
    %c0 = arith.constant 0 : index
    %c0_0 = arith.constant 0 : index
    %c0_1 = arith.constant 0 : index
    %0 = vector.load %arg1[%c0, %c0_0, %c0_1] : memref<2x2x16xf32, #tpu.memory_space<vmem>>, vector<1x2x16xf32>
    %1 = vector.shape_cast %0 : vector<1x2x16xf32> to vector<2x16xf32>
    %c1 = arith.constant 1 : index
    %c0_2 = arith.constant 0 : index
    %c0_3 = arith.constant 0 : index
    %2 = vector.load %arg1[%c1, %c0_2, %c0_3] : memref<2x2x16xf32, #tpu.memory_space<vmem>>, vector<1x2x16xf32>
    %3 = vector.shape_cast %2 : vector<1x2x16xf32> to vector<2x16xf32>
    %c147 = arith.constant 147 : index
    %c0_4 = arith.constant 0 : index
    %4 = vector.load %arg2[%c147, %c0_4] : memref<328x64xf32, #tpu.memory_space<vmem>>, vector<16x64xf32>
    %c163 = arith.constant 163 : index
    %c0_5 = arith.constant 0 : index
    %5 = vector.load %arg2[%c163, %c0_5] : memref<328x64xf32, #tpu.memory_space<vmem>>, vector<64x64xf32>
    %c227 = arith.constant 227 : index
    %c0_6 = arith.constant 0 : index
    %6 = vector.load %arg2[%c227, %c0_6] : memref<328x64xf32, #tpu.memory_space<vmem>>, vector<64x32xf32>
    %c291 = arith.constant 291 : index
    %c0_7 = arith.constant 0 : index
    %7 = vector.load %arg2[%c291, %c0_7] : memref<328x64xf32, #tpu.memory_space<vmem>>, vector<1x64xf32>
    %c292 = arith.constant 292 : index
    %c0_8 = arith.constant 0 : index
    %8 = vector.load %arg2[%c292, %c0_8] : memref<328x64xf32, #tpu.memory_space<vmem>>, vector<1x64xf32>
    %c293 = arith.constant 293 : index
    %c0_9 = arith.constant 0 : index
    %9 = vector.load %arg2[%c293, %c0_9] : memref<328x64xf32, #tpu.memory_space<vmem>>, vector<1x32xf32>
    %cst = arith.constant dense<0.000000e+00> : vector<2x64xf32>
    %10 = tpu.matmul %3, %4, %cst {dimension_numbers = #tpu.dot_dimension_numbers<[1], [0], [0], [1], [0, 0, 1, 1], [], []>} : vector<2x16xf32>, vector<16x64xf32>, vector<2x64xf32> -> vector<2x64xf32>
    %11 = vector.broadcast %7 : vector<1x64xf32> to vector<2x64xf32>
    %12 = arith.addf %10, %11 : vector<2x64xf32>
    %13 = arith.negf %12 : vector<2x64xf32>
    %14 = math.exp %13 : vector<2x64xf32>
    %cst_10 = arith.constant 1.000000e+00 : f32
    %15 = vector.broadcast %cst_10 : f32 to vector<2x64xf32>
    %16 = arith.addf %15, %14 : vector<2x64xf32>
    %17 = arith.divf %15, %16 : vector<2x64xf32>
    %cst_11 = arith.constant dense<0.000000e+00> : vector<2x64xf32>
    %18 = tpu.matmul %17, %5, %cst_11 {dimension_numbers = #tpu.dot_dimension_numbers<[1], [0], [0], [1], [0, 0, 1, 1], [], []>} : vector<2x64xf32>, vector<64x64xf32>, vector<2x64xf32> -> vector<2x64xf32>
    %19 = vector.broadcast %8 : vector<1x64xf32> to vector<2x64xf32>
    %20 = arith.addf %18, %19 : vector<2x64xf32>
    %21 = arith.negf %20 : vector<2x64xf32>
    %22 = math.exp %21 : vector<2x64xf32>
    %cst_12 = arith.constant 1.000000e+00 : f32
    %23 = vector.broadcast %cst_12 : f32 to vector<2x64xf32>
    %24 = arith.addf %23, %22 : vector<2x64xf32>
    %25 = arith.divf %23, %24 : vector<2x64xf32>
    %cst_13 = arith.constant dense<0.000000e+00> : vector<2x32xf32>
    %26 = tpu.matmul %25, %6, %cst_13 {dimension_numbers = #tpu.dot_dimension_numbers<[1], [0], [0], [1], [0, 0, 1, 1], [], []>} : vector<2x64xf32>, vector<64x32xf32>, vector<2x32xf32> -> vector<2x32xf32>
    %27 = vector.broadcast %9 : vector<1x32xf32> to vector<2x32xf32>
    %28 = arith.addf %26, %27 : vector<2x32xf32>
    %29 = vector.extract_strided_slice %28 {offsets = [0, 0], sizes = [2, 16], strides = [1, 1]} : vector<2x32xf32> to vector<2x16xf32>
    %30 = vector.extract_strided_slice %28 {offsets = [0, 16], sizes = [2, 16], strides = [1, 1]} : vector<2x32xf32> to vector<2x16xf32>
    %31 = arith.subf %1, %30 : vector<2x16xf32>
    %cst_14 = arith.constant 0.000000e+00 : f32
    %32 = vector.broadcast %cst_14 : f32 to vector<2x16xf32>
    %33 = arith.subf %32, %29 : vector<2x16xf32>
    %34 = math.exp %33 : vector<2x16xf32>
    %35 = arith.mulf %31, %34 : vector<2x16xf32>
    %c0_15 = arith.constant 0 : index
    %c0_16 = arith.constant 0 : index
    %36 = vector.load %arg2[%c0_15, %c0_16] : memref<328x64xf32, #tpu.memory_space<vmem>>, vector<16x64xf32>
    %c16 = arith.constant 16 : index
    %c0_17 = arith.constant 0 : index
    %37 = vector.load %arg2[%c16, %c0_17] : memref<328x64xf32, #tpu.memory_space<vmem>>, vector<64x64xf32>
    %c80 = arith.constant 80 : index
    %c0_18 = arith.constant 0 : index
    %38 = vector.load %arg2[%c80, %c0_18] : memref<328x64xf32, #tpu.memory_space<vmem>>, vector<64x32xf32>
    %c144 = arith.constant 144 : index
    %c0_19 = arith.constant 0 : index
    %39 = vector.load %arg2[%c144, %c0_19] : memref<328x64xf32, #tpu.memory_space<vmem>>, vector<1x64xf32>
    %c145 = arith.constant 145 : index
    %c0_20 = arith.constant 0 : index
    %40 = vector.load %arg2[%c145, %c0_20] : memref<328x64xf32, #tpu.memory_space<vmem>>, vector<1x64xf32>
    %c146 = arith.constant 146 : index
    %c0_21 = arith.constant 0 : index
    %41 = vector.load %arg2[%c146, %c0_21] : memref<328x64xf32, #tpu.memory_space<vmem>>, vector<1x32xf32>
    %cst_22 = arith.constant dense<0.000000e+00> : vector<2x64xf32>
    %42 = tpu.matmul %35, %36, %cst_22 {dimension_numbers = #tpu.dot_dimension_numbers<[1], [0], [0], [1], [0, 0, 1, 1], [], []>} : vector<2x16xf32>, vector<16x64xf32>, vector<2x64xf32> -> vector<2x64xf32>
    %43 = vector.broadcast %39 : vector<1x64xf32> to vector<2x64xf32>
    %44 = arith.addf %42, %43 : vector<2x64xf32>
    %45 = arith.negf %44 : vector<2x64xf32>
    %46 = math.exp %45 : vector<2x64xf32>
    %cst_23 = arith.constant 1.000000e+00 : f32
    %47 = vector.broadcast %cst_23 : f32 to vector<2x64xf32>
    %48 = arith.addf %47, %46 : vector<2x64xf32>
    %49 = arith.divf %47, %48 : vector<2x64xf32>
    %cst_24 = arith.constant dense<0.000000e+00> : vector<2x64xf32>
    %50 = tpu.matmul %49, %37, %cst_24 {dimension_numbers = #tpu.dot_dimension_numbers<[1], [0], [0], [1], [0, 0, 1, 1], [], []>} : vector<2x64xf32>, vector<64x64xf32>, vector<2x64xf32> -> vector<2x64xf32>
    %51 = vector.broadcast %40 : vector<1x64xf32> to vector<2x64xf32>
    %52 = arith.addf %50, %51 : vector<2x64xf32>
    %53 = arith.negf %52 : vector<2x64xf32>
    %54 = math.exp %53 : vector<2x64xf32>
    %cst_25 = arith.constant 1.000000e+00 : f32
    %55 = vector.broadcast %cst_25 : f32 to vector<2x64xf32>
    %56 = arith.addf %55, %54 : vector<2x64xf32>
    %57 = arith.divf %55, %56 : vector<2x64xf32>
    %cst_26 = arith.constant dense<0.000000e+00> : vector<2x32xf32>
    %58 = tpu.matmul %57, %38, %cst_26 {dimension_numbers = #tpu.dot_dimension_numbers<[1], [0], [0], [1], [0, 0, 1, 1], [], []>} : vector<2x64xf32>, vector<64x32xf32>, vector<2x32xf32> -> vector<2x32xf32>
    %59 = vector.broadcast %41 : vector<1x32xf32> to vector<2x32xf32>
    %60 = arith.addf %58, %59 : vector<2x32xf32>
    %61 = vector.extract_strided_slice %60 {offsets = [0, 0], sizes = [2, 16], strides = [1, 1]} : vector<2x32xf32> to vector<2x16xf32>
    %62 = vector.extract_strided_slice %60 {offsets = [0, 16], sizes = [2, 16], strides = [1, 1]} : vector<2x32xf32> to vector<2x16xf32>
    %63 = arith.subf %3, %62 : vector<2x16xf32>
    %cst_27 = arith.constant 0.000000e+00 : f32
    %64 = vector.broadcast %cst_27 : f32 to vector<2x16xf32>
    %65 = arith.subf %64, %61 : vector<2x16xf32>
    %66 = math.exp %65 : vector<2x16xf32>
    %67 = arith.mulf %63, %66 : vector<2x16xf32>
    %c294 = arith.constant 294 : index
    %c0_28 = arith.constant 0 : index
    %68 = vector.load %arg2[%c294, %c0_28] : memref<328x64xf32, #tpu.memory_space<vmem>>, vector<16x32xf32>
    %c310 = arith.constant 310 : index
    %c0_29 = arith.constant 0 : index
    %69 = vector.load %arg2[%c310, %c0_29] : memref<328x64xf32, #tpu.memory_space<vmem>>, vector<16x32xf32>
    %cst_30 = arith.constant dense<0.000000e+00> : vector<2x32xf32>
    %70 = tpu.matmul %35, %68, %cst_30 {dimension_numbers = #tpu.dot_dimension_numbers<[1], [0], [0], [1], [0, 0, 1, 1], [], []>} : vector<2x16xf32>, vector<16x32xf32>, vector<2x32xf32> -> vector<2x32xf32>
    %cst_31 = arith.constant dense<0.000000e+00> : vector<2x32xf32>
    %71 = tpu.matmul %67, %69, %cst_31 {dimension_numbers = #tpu.dot_dimension_numbers<[1], [0], [0], [1], [0, 0, 1, 1], [], []>} : vector<2x16xf32>, vector<16x32xf32>, vector<2x32xf32> -> vector<2x32xf32>
    %72 = arith.addf %70, %71 : vector<2x32xf32>
    %c326 = arith.constant 326 : index
    %c0_32 = arith.constant 0 : index
    %73 = vector.load %arg2[%c326, %c0_32] : memref<328x64xf32, #tpu.memory_space<vmem>>, vector<1x32xf32>
    %cst_33 = arith.constant 0.000000e+00 : f32
    %74 = vector.broadcast %cst_33 : f32 to vector<2x32xf32>
    %75 = arith.maximumf %72, %74 : vector<2x32xf32>
    %76 = math.absf %72 : vector<2x32xf32>
    %cst_34 = arith.constant 0.000000e+00 : f32
    %77 = vector.broadcast %cst_34 : f32 to vector<2x32xf32>
    %78 = arith.subf %77, %76 : vector<2x32xf32>
    %79 = math.exp %78 : vector<2x32xf32>
    %80 = math.log1p %79 : vector<2x32xf32>
    %81 = arith.addf %75, %80 : vector<2x32xf32>
    %82 = arith.subf %81, %72 : vector<2x32xf32>
    %83 = vector.broadcast %73 : vector<1x32xf32> to vector<2x32xf32>
    %84 = arith.mulf %83, %82 : vector<2x32xf32>
    %85 = arith.addf %72, %84 : vector<2x32xf32>
    %c0_35 = arith.constant 0 : index
    %c0_36 = arith.constant 0 : index
    %86 = vector.load %arg3[%c0_35, %c0_36] : memref<2x32xf32, #tpu.memory_space<vmem>>, vector<2x32xf32>
    tpu.vector_store %arg3[%c0_35, %c0_36], %85 {strides = array<i32>} : memref<2x32xf32, #tpu.memory_space<vmem>>, vector<2x32xf32>,
    return
  }
  func.func @transform_0(%arg0: i32) -> (i32, i32, i32) {
    %c0_i32 = arith.constant 0 : i32
    %c0_i32_0 = arith.constant 0 : i32
    %c0_i32_1 = arith.constant 0 : i32
    return %c0_i32, %arg0, %c0_i32_0 : i32, i32, i32
  }
  func.func @transform_1(%arg0: i32) -> (i32, i32) {
    %c0_i32 = arith.constant 0 : i32
    %c0_i32_0 = arith.constant 0 : i32
    %c0_i32_1 = arith.constant 0 : i32
    return %c0_i32, %c0_i32_0 : i32, i32
  }
  func.func @transform_2(%arg0: i32) -> (i32, i32) {
    %c0_i32 = arith.constant 0 : i32
    %c0_i32_0 = arith.constant 0 : i32
    return %arg0, %c0_i32 : i32, i32
  }
}

</mosaic_0001>

<bundles_post_ra>
// kernel: tpu_custom_call.1
= control target key start
LH: loop header
LB: loop body
LE: loop exit
PB: predicated region body
PF: predicated region fallthrough
CT: control target
= control target key end

     0   :  { %v1036_v2 = vmov 0.0|0.0   ;;  %vm1037_vm0 = vmmov 0   ;;  %v1038_v4 = vmov 0.0   ;;  %s1269_s0 = inlined_call_operand.vmem [shape: f32[2,2,16], index: 0, kind: input, shape index: {}]   ;;  %s1270_s1 = inlined_call_operand.vmem [shape: f32[328,64], index: 1, kind: input, shape index: {}]   ;;  %s1271_s2 = inlined_call_operand.hbm [shape: f32[2,32], index: 2, kind: output, shape index: {}]  }
   0x1   :  { %v15_v0 = vld [vmem:[%s1270_s1 + $0x93] sm:$0xff]  ;;  %v16_v1 = vld [vmem:[%s1270_s1 + $0x9b] sm:$0xff]  ;;  %921 = vmatprep.subr.bf16.mxu1 %v1036_v2  ;;  %821 = vmatprep.mubr.msk.f32.mxu1 %vm1037_vm0, %v1038_v4 }
   0x2   :  { %v922_v3 = vpack.c.bf16 %v16_v1, %v15_v0 }
   0x3   :  { %7 = vsyncpa [#allocation3], 0  ;;  %936 = vmatprep.subr.bf16.mxu0 %v1036_v2  ;;  %859 = vmatprep.mubr.msk.f32.mxu0 %vm1037_vm0, %v1038_v4  ;;  %v1071_v5 = vld [vmem:[%s1269_s0 + $0x2] sm:$0x3]  ;;  %vm40_vm1 = vcmask 130048   ;;  %v18_v7 = vld [vmem:[%s1270_s1 + $0xab] sm:$0xff] }
   0x4   :  { %923 = vmatpush3.bf16.msra.mxu1 %v922_v3  ;;  %v17_v6 = vld [vmem:[%s1270_s1 + $0xa3] sm:$0xff]  ;;  %v19_v9 = vld [vmem:[%s1270_s1 + $0xb3] sm:$0xff]  ;;  %v20_v10 = vld [vmem:[%s1270_s1 + $0xbb] sm:$0xff]  ;;  %vm124_vm2 = vcmask 523264   ;;  %s1039_s29 = smov 112   ;;  %s1040_s22 = smov [#allocation2]  }
   0x5   :  { %924 = vmatprep.subr.bf16.mxu1 %v1036_v2  ;;  %v925_v8 = vpack.c.bf16 %v18_v7, %v17_v6  ;;  %v928_v11 = vpack.c.bf16 %v20_v10, %v19_v9  ;;  %v21_v12 = vld [vmem:[%s1270_s1 + $0xc3] sm:$0xff]  ;;  %v22_v13 = vld [vmem:[%s1270_s1 + $0xcb] sm:$0xff]  ;;  %v23_v15 = vld [vmem:[%s1270_s1 + $0xd3] sm:$0xff]  ;;  %s741_s23 = sshll.u32 %s1040_s22, 4  ;;  %vm733_vm4 = vcmask 254976   ;;  %s742_s23 = int_to_ptr.vmem [resolvable:$true] %s741_s23 }
   0x6   :  { %v931_v14 = vpack.c.bf16 %v22_v13, %v21_v12  ;;  %v24_v16 = vld [vmem:[%s1270_s1 + $0xdb] sm:$0xff]  ;;  %v750_v18 = vld [vmem:[%s1270_s1 + $0x123] ss:$0 sm:$0xff]  ;;  %v26_v27 = vld [vmem:[%s1270_s1 + $0xeb] sm:$0xff]  ;;  %s1012_s24 = scalar_lea.vmem %s742_s23, 32  ;;  %p1017_p1 = scmp.lt.s32.totalorder %s742_s23, %s742_s23 }
   0x7   :  { %822 = vmatmul.mubr.msk.f32.vlgmr.msra.gmra.mrb[0].mxu1 %vm40_vm1, %v1071_v5  ;;  %v934_v17 = vpack.c.bf16 %v24_v16, %v23_v15  ;;  %v25_v26 = vld [vmem:[%s1270_s1 + $0xe3] sm:$0xff]  ;;  %v27_v29 = vld [vmem:[%s1270_s1 + $0xf3] sm:$0xff]  ;;  %v28_v30 = vld [vmem:[%s1270_s1 + $0xfb] sm:$0xff]  ;;  %p1013_p0 = scmp.ne.s32.totalorder %s742_s23, %s1012_s24  ;;  %p1018_p2 = scmp.lt.s32.totalorder %s1012_s24, %s1012_s24 }
   0x8   :  { %840 = vmatprep.mubr.msk.f32.mxu1 %vm1037_vm0, %v1038_v4  ;;  %926 = vmatpush3.bf16.msra.mxu1 %v925_v8  ;;  %v937_v28 = vpack.c.bf16 %v26_v27, %v25_v26  ;;  %v940_v31 = vpack.c.bf16 %v28_v30, %v27_v29  ;;  %v29_v32 = vld [vmem:[%s1270_s1 + $0x103] sm:$0xff]  ;;  %v30_v33 = vld [vmem:[%s1270_s1 + $0x10b] sm:$0xff]  ;;  %v31_v35 = vld [vmem:[%s1270_s1 + $0x113] sm:$0xff] }
   0x9   :  { %927 = vmatprep.subr.bf16.mxu1 %v1036_v2  ;;  %v943_v34 = vpack.c.bf16 %v30_v33, %v29_v32  ;;  %v32_v36 = vld [vmem:[%s1270_s1 + $0x11b] sm:$0xff]  ;;  %v753_v38 = vld [vmem:[%s1270_s1 + $0x124] ss:$0 sm:$0xff]  ;;  %v291_v47 = vld [vmem:[%s1270_s1 + $0x8] sm:$0xff]  ;;  %p1019_p3 = por %p1018_p2, %p1017_p1 }
   0xa   :  { %938 = vmatpush3.bf16.msra.mxu0 %v937_v28  ;;  %v946_v37 = vpack.c.bf16 %v32_v36, %v31_v35  ;;  %v290_v46 = vld [vmem:[%s1270_s1] sm:$0xff]  ;;  %v292_v60 = vld [vmem:[%s1270_s1 + $0x10] sm:$0xff]  ;;  %v293_v61 = vld [vmem:[%s1270_s1 + $0x18] sm:$0xff] }
   0xb   :  { %939 = vmatprep.subr.bf16.mxu0 %v1036_v2  ;;  %v949_v48 = vpack.c.bf16 %v291_v47, %v290_v46  ;;  %v756_v49 = vld [vmem:[%s1270_s1 + $0x125] ss:$0 sm:$0xff]  ;;  %v12_v55 = vld [vmem:[%s1269_s0] sm:$0x3]  ;;  %v952_v62 = vpack.c.bf16 %v293_v61, %v292_v60  ;;  %v295_v0 = vld [vmem:[%s1270_s1 + $0x28] sm:$0xff]  ;;  %p1020_p4 = pnand %p1019_p3, %p1013_p0 }
   0xc   :  { %929 = vmatpush3.bf16.msra.mxu1 %v928_v11  ;;  %v294_v63 = vld [vmem:[%s1270_s1 + $0x20] sm:$0xff]  ;;  %v296_v3 = vld [vmem:[%s1270_s1 + $0x30] sm:$0xff]  ;;  %v297_v6 = vld [vmem:[%s1270_s1 + $0x38] sm:$0xff] }
   0xd   :  { %930 = vmatprep.subr.bf16.mxu1 %v1036_v2  ;;  %v955_v1 = vpack.c.bf16 %v295_v0, %v294_v63  ;;  %v958_v7 = vpack.c.bf16 %v297_v6, %v296_v3  ;;  %v298_v8 = vld [vmem:[%s1270_s1 + $0x40] sm:$0xff]  ;;  %v299_v9 = vld [vmem:[%s1270_s1 + $0x48] sm:$0xff]  ;;  %v758_v11 = vld [vmem:[%s1270_s1 + $0x90] ss:$0 sm:$0xff] }
   0xe   :  { %941 = vmatpush3.bf16.msra.mxu0 %v940_v31  ;;  %v961_v10 = vpack.c.bf16 %v299_v9, %v298_v8  ;;  %v305_v26 = vld [vmem:[%s1270_s1 + $0x78] sm:$0xff]  ;;  %v306_v28 = vld [vmem:[%s1270_s1 + $0x80] sm:$0xff]  ;;  %v307_v29 = vld [vmem:[%s1270_s1 + $0x88] sm:$0xff] }
   0xf   :  { %942 = vmatprep.subr.bf16.mxu0 %v1036_v2  ;;  %v973_v30 = vpack.c.bf16 %v307_v29, %v306_v28  ;;  %v761_v31 = vld [vmem:[%s1270_s1 + $0x91] ss:$0 sm:$0xff] }
  0x10   :  { %932 = vmatpush3.bf16.msra.mxu1 %v931_v14 }
  0x11   :  { %933 = vmatprep.subr.bf16.mxu1 %v1036_v2 }
  0x12   :  { %944 = vmatpush3.bf16.msra.mxu0 %v943_v34 }
  0x13   :  { %945 = vmatprep.subr.bf16.mxu0 %v1036_v2 }
  0x14   :  { %935 = vmatpush3.bf16.msra.mxu1 %v934_v17 }
  0x15   :  { %948 = vmatprep.subr.bf16.mxu1 %v1036_v2 }
  0x16   :  { %947 = vmatpush3.bf16.msra.mxu0 %v946_v37 }
  0x17   :  { %951 = vmatprep.subr.bf16.mxu0 %v1036_v2 }
  0xda   :  { %v110_v19 = vpop.f32.mrb[0].mxu1 }
  0xdb   :  { %v111_v20 = vadd.f32 %v750_v18, %v110_v19  ;;  %v823_v21 = vpop.f32.mrb[1].mxu1  ;;  %v300_v19 = vld [vmem:[%s1270_s1 + $0x50] sm:$0xff] }
  0xdd   :  { %v752_v22 = vmul.f32 -1.442695, %v111_v20  ;;  %v301_v20 = vld [vmem:[%s1270_s1 + $0x58] sm:$0xff] }
  0xde   :  { %v964_v21 = vpack.c.bf16 %v301_v20, %v300_v19 }
  0xdf   :  { %988 = vpow2.f32 %v752_v22  ;;  %v302_v22 = vld [vmem:[%s1270_s1 + $0x60] sm:$0xff] }
  0xe9   :  { %v989_v23 = vpop.eup %988 }
  0xea   :  { %v117_v24 = vadd.f32 1.0, %v989_v23  ;;  %v303_v23 = vld [vmem:[%s1270_s1 + $0x68] sm:$0xff] }
  0xec   :  { %990 = vrcp.f32 %v117_v24  ;;  %v967_v24 = vpack.c.bf16 %v303_v23, %v302_v22 }
  0xf6   :  { %v991_v25 = vpop.eup %990 }
  0xf7   :  { %841 = vmatmul.mubr.msk.f32.vlgmr.msra.gmra.mrb[2].mxu1 %vm124_vm2, %v991_v25  ;;  %v304_v25 = vld [vmem:[%s1270_s1 + $0x70] sm:$0xff] }
  0xf8   :  { %866 = vmatprep.mubr.msk.f32.mxu1 %vm1037_vm0, %v1038_v4  ;;  %950 = vmatpush3.bf16.msra.mxu1 %v949_v48  ;;  %v970_v27 = vpack.c.bf16 %v305_v26, %v304_v25  ;;  %v563_v48 = vld [vmem:[%s1270_s1 + $0x126] sm:$0xff] }
  0xf9   :  { %963 = vmatprep.subr.bf16.mxu1 %v1036_v2 }
 0x1ca   :  { %v194_v39 = vpop.f32.mrb[2].mxu1 }
 0x1cb   :  { %v195_v40 = vadd.f32 %v753_v38, %v194_v39  ;;  %v842_v41 = vpop.f32.mrb[3].mxu1  ;;  %v565_v39 = vld [vmem:[%s1270_s1 + $0x136] sm:$0xff] }
 0x1cd   :  { %v755_v42 = vmul.f32 -1.442695, %v195_v40  ;;  %v566_v40 = vld [vmem:[%s1270_s1 + $0x13e] sm:$0xff] }
 0x1ce   :  { %v976_v41 = vpack.c.bf16 %v566_v40, %v565_v39 }
 0x1cf   :  { %992 = vpow2.f32 %v755_v42  ;;  %v764_v42 = vld [vmem:[%s1270_s1 + $0x92] ss:$0 sm:$0xff] }
 0x1d9   :  { %v993_v43 = vpop.eup %992 }
 0x1da   :  { %v201_v44 = vadd.f32 1.0, %v993_v43 }
 0x1dc   :  { %994 = vrcp.f32 %v201_v44 }
 0x1e6   :  { %v995_v45 = vpop.eup %994 }
 0x1e7   :  { %860 = vmatmul.mubr.msk.f32.vlgmr.msra.gmra.mrb[0].mxu0 %vm124_vm2, %v995_v45 }
 0x1e8   :  { %885 = vmatprep.mubr.msk.f32.mxu0 %vm1037_vm0, %v1038_v4  ;;  %953 = vmatpush3.bf16.msra.mxu0 %v952_v62 }
 0x1e9   :  { %954 = vmatprep.subr.bf16.mxu0 %v1036_v2 }
 0x1ec   :  { %956 = vmatpush3.bf16.msra.mxu0 %v955_v1 }
 0x1ed   :  { %957 = vmatprep.subr.bf16.mxu0 %v1036_v2 }
 0x1f0   :  { %959 = vmatpush3.bf16.msra.mxu0 %v958_v7 }
 0x1f1   :  { %960 = vmatprep.subr.bf16.mxu0 %v1036_v2 }
 0x1f4   :  { %962 = vmatpush3.bf16.msra.mxu0 %v961_v10 }
 0x1f5   :  { %975 = vmatprep.subr.bf16.mxu0 %v1036_v2 }
 0x2ba   :  { %v277_v50 = vpop.f32.mrb[0].mxu0 }
 0x2bb   :  { %v278_v51 = vadd.f32 %v756_v49, %v277_v50  ;;  %v861_v52 = vpop.f32.mrb[1].mxu0 }
 0x2bd   :  { %282 = vrot.lane.b32.xlu0 %v278_v51, %s1039_s29  ;;  %v286_v53 = vsub.f32 0.0, %v278_v51 }
 0x2bf   :  { %v287_v54 = vmul.f32 1.442695, %v286_v53 }
 0x2c1   :  { %996 = vpow2.f32 %v287_v54 }
 0x2cb   :  { %v997_v58 = vpop.eup %996 }
 0x32f   :  { %v283_v56 = vpop.permute.xlu0 %282 }
 0x330   :  { %v285_v57 = vsub.f32 %v12_v55, %v283_v56 }
 0x332   :  { %v1160_v59 = vmul.f32 %v997_v58, %v285_v57 }
 0x334   :  { %867 = vmatmul.mubr.msk.f32.vlgmr.msra.gmra.mrb[4].mxu1 %vm40_vm1, %v1160_v59 }
 0x335   :  { %904 = vmatprep.mubr.msk.f32.mxu1 %vm1037_vm0, %v1038_v4  ;;  %965 = vmatpush3.bf16.msra.mxu1 %v964_v21 }
 0x336   :  { %966 = vmatprep.subr.bf16.mxu1 %v1036_v2 }
 0x339   :  { %968 = vmatpush3.bf16.msra.mxu1 %v967_v24 }
 0x33a   :  { %969 = vmatprep.subr.bf16.mxu1 %v1036_v2 }
 0x33d   :  { %971 = vmatpush3.bf16.msra.mxu1 %v970_v27 }
 0x33e   :  { %972 = vmatprep.subr.bf16.mxu1 %v1036_v2 }
 0x341   :  { %974 = vmatpush3.bf16.msra.mxu1 %v973_v30 }
 0x407   :  { %v384_v12 = vpop.f32.mrb[4].mxu1 }
 0x408   :  { %v385_v13 = vadd.f32 %v758_v11, %v384_v12  ;;  %v868_v14 = vpop.f32.mrb[5].mxu1 }
 0x40a   :  { %v760_v15 = vmul.f32 -1.442695, %v385_v13 }
 0x40c   :  { %998 = vpow2.f32 %v760_v15 }
 0x416   :  { %v999_v16 = vpop.eup %998 }
 0x417   :  { %v391_v17 = vadd.f32 1.0, %v999_v16 }
 0x419   :  { %1000 = vrcp.f32 %v391_v17 }
 0x423   :  { %v1001_v18 = vpop.eup %1000 }
 0x424   :  { %886 = vmatmul.mubr.msk.f32.vlgmr.msra.gmra.mrb[2].mxu0 %vm124_vm2, %v1001_v18 }
 0x425   :  { %911 = vmatprep.mubr.msk.f32.mxu0 %vm1037_vm0, %v1038_v4  ;;  %977 = vmatpush3.bf16.msra.mxu0 %v976_v41 }
 0x426   :  { %978 = vmatprep.subr.bf16.mxu0 %v1036_v2  ;;  %v564_v2 = vld [vmem:[%s1270_s1 + $0x12e] sm:$0xff] }
 0x427   :  { %v979_v52 = vpack.c.bf16 %v564_v2, %v563_v48 }
 0x4f7   :  { %v467_v32 = vpop.f32.mrb[2].mxu0 }
 0x4f8   :  { %v468_v33 = vadd.f32 %v761_v31, %v467_v32  ;;  %v887_v34 = vpop.f32.mrb[3].mxu0 }
 0x4fa   :  { %v763_v35 = vmul.f32 -1.442695, %v468_v33 }
 0x4fc   :  { %1002 = vpow2.f32 %v763_v35 }
 0x506   :  { %v1003_v36 = vpop.eup %1002 }
 0x507   :  { %v474_v37 = vadd.f32 1.0, %v1003_v36 }
 0x509   :  { %1004 = vrcp.f32 %v474_v37 }
 0x513   :  { %v1005_v38 = vpop.eup %1004 }
 0x514   :  { %905 = vmatmul.mubr.msk.f32.vlgmr.msra.gmra.mrb[6].mxu1 %vm124_vm2, %v1005_v38 }
 0x5e7   :  { %v550_v43 = vpop.f32.mrb[6].mxu1 }
 0x5e8   :  { %v551_v44 = vadd.f32 %v764_v42, %v550_v43  ;;  %v906_v45 = vpop.f32.mrb[7].mxu1 }
 0x5ea   :  { %555 = vrot.lane.b32.xlu0 %v551_v44, %s1039_s29  ;;  %v559_v46 = vsub.f32 0.0, %v551_v44 }
 0x5ec   :  { %v560_v47 = vmul.f32 1.442695, %v559_v46 }
 0x5ee   :  { %1006 = vpow2.f32 %v560_v47 }
 0x5f8   :  { %v1007_v51 = vpop.eup %1006 }
 0x65c   :  { %v556_v49 = vpop.permute.xlu0 %555 }
 0x65d   :  { %v558_v50 = vsub.f32 %v1071_v5, %v556_v49 }
 0x65f   :  { %v562_v53 = vmul.f32 %v1007_v51, %v558_v50 }
 0x661   :  { %912 = vmatmul.mubr.msk.f32.vlgmr.msra.gmra.mrb[4].mxu0 %vm40_vm1, %v562_v53 }
 0x662   :  { %980 = vmatpush3.bf16.msra.mxu0 %v979_v52  ;;  %918 = vmatprep.mubr.msk.f32.mxu0 %vm1037_vm0, %v1038_v4 }
 0x669   :  { %919 = vmatmul.mubr.msk.f32.vlgmr.msra.gmra.mrb[4].mxu0 %vm40_vm1, %v1160_v59  ;;  %v768_v59 = vld [vmem:[%s1270_s1 + $0x146] ss:$0 sm:$0xff] }
 0x73c   :  { %v706_v54 = vpop.f32.mrb[4].mxu0 }
 0x73d   :  { %v712_v55 = vand.u32 2147483647, %v706_v54  ;;  %v920_v56 = vpop.f32.mrb[5].mxu0  ;;  %v711_v6 = vmax.f32 %v706_v54, 0.0 }
 0x73f   :  { %v713_v57 = vsub.f32 0.0, %v712_v55 }
 0x741   :  { %v714_v58 = vmul.f32 1.442695, %v713_v57 }
 0x743   :  { %1008 = vpow2.f32 %v714_v58 }
 0x74d   :  { %v1009_v60 = vpop.eup %1008 }
 0x74e   :  { %v716_v5 = vadd.f32 1.0, %v1009_v60  ;;  %v719_v61 = vmul.f32 -0.5, %v1009_v60  ;;  %v722_v63 = vand.u32 2147483647, %v1009_v60 }
 0x750   :  { %1010 = vlog2.f32 %v716_v5  ;;  %v720_v62 = vadd.f32 1.0, %v719_v61  ;;  %vm723_vm3 = vcmp.lt.f32.partialorder %v722_v63, 0.0004427343 }
 0x752   :  { %v721_v3 = vmul.f32 %v1009_v60, %v720_v62 }
 0x75a   :  { %v1011_v0 = vpop.eup %1010 }
 0x75b   :  { %v718_v1 = vmul.f32 0.6931472, %v1011_v0 }
 0x75d   :  { %v724_v4 = vsel %vm723_vm3, %v721_v3, %v718_v1 }
 0x75e   :  { %v725_v7 = vadd.f32 %v724_v4, %v711_v6 }
 0x760   :  { %v726_v8 = vsub.f32 %v725_v7, %v706_v54 }
 0x762   :  { %v731_v9 = vmul.f32 %v768_v59, %v726_v8 }
 0x764   :  { %v732_v10 = vadd.f32 %v731_v9, %v706_v54 }
 0x766   :  { %734 = vst.msk [vmem:[#allocation2] sm:$0x3] %vm733_vm4, %v732_v10 }
 0x767   :  { %1023 = shalt.err (!%p1020_p4)
}
 0x768   :  { %s1024_s27 = scalar_lea.hbm %s1271_s2, 32 }
 0x769   :  { %p1025_p5 = scmp.ne.s32.totalorder %s1271_s2, %s1024_s27  ;;  %p1028_p6 = scmp.lt.u32.totalorder %s1024_s27, %s1271_s2 }
 0x76b   :  { %p1030_p7 = pnand %p1028_p6, %p1025_p5 }
 0x76d   :  { %1033 = shalt.err (!%p1030_p7)
}
 0x76e   :  { %744 = dma.vmem_to_hbm [thread:$0]  %s742_s23, 32, %s1271_s2, [#allocation3]  }
 0x76f   :  { %1034 = dma.done.wait [#allocation3], 32  }
 0x770   :  { %1035 = vsyncadd [#allocation3], 4294967264 }
 0x771   :  { %748 = vsyncpa [#allocation3], 1 }

</bundles_post_ra>
